<compile_context>
chip_gen: v6e
topology: v6e:2x2x1
jax: 0.10.0
libtpu: 0.0.40
codegen_flags: <defaults>
</compile_context>

<pallas_src>
import functools

import jax
import jax.numpy as jnp
from jax.experimental import pallas as pl
from jax.experimental.pallas import tpu as pltpu

EPS = 1e-5
LANE = 128


# ---------------------------------------------------------------------------
# Kernels (one grid point == one row tile of TM rows covering whole sequences)
# ---------------------------------------------------------------------------

def _stats(y):
    # Fused single-pass sum / sum-of-squares epilogue while the f32 tile is
    # still hot.  Shape (2, C), f32.
    return jnp.concatenate([jnp.sum(y, axis=0, keepdims=True),
                            jnp.sum(y * y, axis=0, keepdims=True)], axis=0)


def _conv1_kernel(x_ref, w1_ref, y1_ref, st1_ref):
    y = jnp.dot(x_ref[...], w1_ref[...], preferred_element_type=jnp.float32)
    y1_ref[...] = y.astype(y1_ref.dtype)
    st1_ref[0] = _stats(y)


def _conv2_kernel(L, y1_ref, sc1_ref, sh1_ref, w2_ref, y2_ref, st2_ref, slab_ref):
    TM = y1_ref.shape[0]
    Pp = y1_ref.shape[1]
    # bn1 in affine form (scale/shift precomputed from global stats) + relu.
    h = jnp.maximum(y1_ref[...].astype(jnp.float32) * sc1_ref[...] + sh1_ref[...],
                    0.0)

    # k=3 neighbour taps via XLU sublane rolls + (TM,1) sequence-boundary
    # masks.  Tiles cover whole sequences, so the wrap-around rows of the roll
    # are exactly the masked boundary rows (lpos==0 / lpos==L-1).
    lpos = jax.lax.broadcasted_iota(jnp.int32, (TM, 1), 0) % L
    left = jnp.where(lpos > 0, pltpu.roll(h, 1, axis=0), 0.0)
    right = jnp.where(lpos < L - 1, pltpu.roll(h, TM - 1, axis=0), 0.0)

    dt = slab_ref.dtype
    # Aligned, full-block (unmasked) stores into the slab scratch.
    slab_ref[:, 0:Pp] = left.astype(dt)
    slab_ref[:, Pp:2 * Pp] = h.astype(dt)
    slab_ref[:, 2 * Pp:3 * Pp] = right.astype(dt)

    # ONE fused matmul with the three taps stacked along the contraction dim.
    y = jnp.dot(slab_ref[...], w2_ref[...], preferred_element_type=jnp.float32)
    y2_ref[...] = y.astype(y2_ref.dtype)
    st2_ref[0] = _stats(y)


def _conv3_kernel(y2_ref, sc2_ref, sh2_ref, w3_ref, x_ref, ws_ref,
                  y3_ref, ysc_ref, st3_ref, stsc_ref):
    h2 = jnp.maximum(y2_ref[...].astype(jnp.float32) * sc2_ref[...] + sh2_ref[...],
                     0.0)
    mm_dt = w3_ref.dtype
    # conv3 and shortcut matmuls issued back-to-back to keep the MXU fed.
    y3 = jnp.dot(h2.astype(mm_dt), w3_ref[...], preferred_element_type=jnp.float32)
    ysc = jnp.dot(x_ref[...], ws_ref[...], preferred_element_type=jnp.float32)
    y3_ref[...] = y3.astype(y3_ref.dtype)
    ysc_ref[...] = ysc.astype(ysc_ref.dtype)
    st3_ref[0] = _stats(y3)
    stsc_ref[0] = _stats(ysc)


def _finalize_kernel(y3_ref, ysc_ref, sc3_ref, sh3_ref, scs_ref, shs_ref, o_ref):
    main = y3_ref[...].astype(jnp.float32) * sc3_ref[...] + sh3_ref[...]
    short = ysc_ref[...].astype(jnp.float32) * scs_ref[...] + shs_ref[...]
    o_ref[...] = jnp.maximum(main + short, 0.0).astype(o_ref.dtype)


# ---------------------------------------------------------------------------
# Wrapper
# ---------------------------------------------------------------------------

def _round_up(n, m=LANE):
    return ((n + m - 1) // m) * m


def _pad_axis(a, axis, target):
    pad = target - a.shape[axis]
    if pad == 0:
        return a
    widths = [(0, 0)] * a.ndim
    widths[axis] = (0, pad)
    return jnp.pad(a, widths)


def _choose_tile_rows(N, L, target_rows):
    # Row tiles must cover whole sequences (multiples of L) and divide N*L.
    NL = N * L
    tm = L
    for s in range(1, N + 1):
        if N % s == 0 and s * L <= max(target_rows, L):
            tm = s * L
    if tm % 8 != 0 and tm != NL:
        tm = NL  # full-extent block is always layout-legal
    return tm


def _row_spec(tm, c):
    return pl.BlockSpec((tm, c), lambda i: (i, 0))


def _const_spec(shape):
    # Same block for every row tile -> DMA'd once, stays VMEM-resident.
    return pl.BlockSpec(shape, lambda i: (0,) * len(shape))


def _stats_spec(c):
    return pl.BlockSpec((1, 2, c), lambda i: (i, 0, 0))


def _bn_affine(partials, count, g, b):
    # Fold (sum, sumsq) partials into the BN per-channel affine (scale, shift).
    s = jnp.sum(partials[:, 0, :], axis=0)
    ss = jnp.sum(partials[:, 1, :], axis=0)
    mean = s / count
    var = jnp.maximum(ss / count - mean * mean, 0.0)   # biased batch variance
    scale = g[0] * jax.lax.rsqrt(var + EPS)
    shift = b[0] - mean * scale
    return scale.reshape(1, -1), shift.reshape(1, -1)


@functools.partial(jax.jit, static_argnames=("matmul_dtype", "tile_rows"))
def bottleneck_forward(x_ncl, params, matmul_dtype=jnp.bfloat16, tile_rows=1024):
    """Bottleneck forward (stride=1), BatchNorm1d in training-mode batch stats.

    matmul_dtype=jnp.bfloat16 (default) feeds the MXU at its native rate on
    v5e/v6e/v7x with f32 accumulation and f32 BN math; pass jnp.float32 when
    bitwise-close output matters.
    """
    (w1, g1, b1, w2, g2, b2, w3, g3, b3, ws, gs, bs) = params
    N, Cin, L = x_ncl.shape
    P = w1.shape[1]
    Cout = w3.shape[1]
    NL = N * L
    Cin_p, P_p, Cout_p = _round_up(Cin), _round_up(P), _round_up(Cout)
    mm_dt = matmul_dtype
    msz = jnp.dtype(mm_dt).itemsize

    TM = _choose_tile_rows(N, L, tile_rows)
    n_tiles = NL // TM

    # NCL -> (N*L, C) channels-last, channel dims zero-padded to 128 lanes.
    x_flat = jnp.transpose(x_ncl, (0, 2, 1)).reshape(NL, Cin)
    x_flat = _pad_axis(x_flat, 1, Cin_p).astype(mm_dt)

    w1p = _pad_axis(_pad_axis(w1, 0, Cin_p), 1, P_p).astype(mm_dt)
    # three k-taps stacked along the contraction dim: (3*P_p, P_p)
    w2p = _pad_axis(_pad_axis(w2, 1, P_p), 2, P_p).astype(mm_dt).reshape(3 * P_p, P_p)
    w3p = _pad_axis(_pad_axis(w3, 0, P_p), 1, Cout_p).astype(mm_dt)
    wsp = _pad_axis(_pad_axis(ws, 0, Cin_p), 1, Cout_p).astype(mm_dt)

    # BN affine params zero-padded -> padded channels stay identically 0.
    g1p, b1p = _pad_axis(g1, 1, P_p), _pad_axis(b1, 1, P_p)
    g2p, b2p = _pad_axis(g2, 1, P_p), _pad_axis(b2, 1, P_p)
    g3p, b3p = _pad_axis(g3, 1, Cout_p), _pad_axis(b3, 1, Cout_p)
    gsp, bsp = _pad_axis(gs, 1, Cout_p), _pad_axis(bs, 1, Cout_p)

    # Scoped-VMEM budget sized from the actual per-tile blocks (double-buffered)
    # plus headroom for in-kernel f32 temporaries; clamped to v7x's 64 MiB.
    blk_bytes = (TM * (Cin_p + 2 * P_p + 2 * Cout_p) * msz
                 + TM * Cout_p * 4
                 + (Cin_p * P_p + 3 * P_p * P_p + P_p * Cout_p
                    + Cin_p * Cout_p) * msz)
    scratch_bytes = TM * 3 * P_p * msz
    vmem_limit = int(min(64 << 20,
                         max(16 << 20, 2 * blk_bytes + scratch_bytes + (8 << 20))))
    cparams = pltpu.CompilerParams(
        dimension_semantics=("parallel",),   # v7x: shard row tiles over both TCs
        vmem_limit_bytes=vmem_limit,
    )

    # ---- K1: conv1 (1x1) + bn1 partial stats --------------------------------
    y1, p1 = pl.pallas_call(
        _conv1_kernel,
        grid=(n_tiles,),
        in_specs=[_row_spec(TM, Cin_p), _const_spec((Cin_p, P_p))],
        out_specs=(_row_spec(TM, P_p), _stats_spec(P_p)),
        out_shape=(jax.ShapeDtypeStruct((NL, P_p), mm_dt),
                   jax.ShapeDtypeStruct((n_tiles, 2, P_p), jnp.float32)),
        compiler_params=cparams,
    )(x_flat, w1p)
    sc1, sh1 = _bn_affine(p1, NL, g1p, b1p)

    # ---- K2: bn1+relu + conv2 (k=3, fused 3*P_p matmul) + bn2 partial stats --
    y2, p2 = pl.pallas_call(
        functools.partial(_conv2_kernel, L),
        grid=(n_tiles,),
        in_specs=[_row_spec(TM, P_p), _const_spec((1, P_p)), _const_spec((1, P_p)),
                  _const_spec((3 * P_p, P_p))],
        out_specs=(_row_spec(TM, P_p), _stats_spec(P_p)),
        out_shape=(jax.ShapeDtypeStruct((NL, P_p), mm_dt),
                   jax.ShapeDtypeStruct((n_tiles, 2, P_p), jnp.float32)),
        scratch_shapes=[pltpu.VMEM((TM, 3 * P_p), mm_dt)],
        compiler_params=cparams,
    )(y1, sc1, sh1, w2p)
    sc2, sh2 = _bn_affine(p2, NL, g2p, b2p)

    # ---- K3: bn2+relu + conv3 (1x1) and shortcut conv (1x1) + partial stats --
    y3, ysc, p3, psc = pl.pallas_call(
        _conv3_kernel,
        grid=(n_tiles,),
        in_specs=[_row_spec(TM, P_p), _const_spec((1, P_p)), _const_spec((1, P_p)),
                  _const_spec((P_p, Cout_p)), _row_spec(TM, Cin_p),
                  _const_spec((Cin_p, Cout_p))],
        out_specs=(_row_spec(TM, Cout_p), _row_spec(TM, Cout_p),
                   _stats_spec(Cout_p), _stats_spec(Cout_p)),
        out_shape=(jax.ShapeDtypeStruct((NL, Cout_p), mm_dt),
                   jax.ShapeDtypeStruct((NL, Cout_p), mm_dt),
                   jax.ShapeDtypeStruct((n_tiles, 2, Cout_p), jnp.float32),
                   jax.ShapeDtypeStruct((n_tiles, 2, Cout_p), jnp.float32)),
        compiler_params=cparams,
    )(y2, sc2, sh2, w3p, x_flat, wsp)
    sc3, sh3 = _bn_affine(p3, NL, g3p, b3p)
    scs, shs = _bn_affine(psc, NL, gsp, bsp)

    # ---- K4: bn3 + bn_shortcut + add + relu, lane-dense f32 store -----------
    out_flat = pl.pallas_call(
        _finalize_kernel,
        grid=(n_tiles,),
        in_specs=[_row_spec(TM, Cout_p), _row_spec(TM, Cout_p),
                  _const_spec((1, Cout_p)), _const_spec((1, Cout_p)),
                  _const_spec((1, Cout_p)), _const_spec((1, Cout_p))],
        out_specs=_row_spec(TM, Cout_p),
        out_shape=jax.ShapeDtypeStruct((NL, Cout_p), jnp.float32),
        compiler_params=cparams,
    )(y3, ysc, sc3, sh3, scs, shs)

    # drop channel padding, (N*L, Cout) -> NCL
    out = out_flat[:, :Cout]
    return jnp.transpose(out.reshape(N, L, Cout), (0, 2, 1))


# ---------------------------------------------------------------------------
# Plain-JAX reference (NCL layout), mirroring the PyTorch forward.
# ---------------------------------------------------------------------------

def reference(x_ncl, params):
    (w1, g1, b1, w2, g2, b2, w3, g3, b3, ws, gs, bs) = params
    L = x_ncl.shape[2]

    def bn(y, g, b):
        mean = y.mean(axis=(0, 2), keepdims=True)
        var = ((y - mean) ** 2).mean(axis=(0, 2), keepdims=True)
        return ((y - mean) * jax.lax.rsqrt(var + EPS)
                * g.reshape(1, -1, 1) + b.reshape(1, -1, 1))

    relu = lambda y: jnp.maximum(y, 0.0)

    h = relu(bn(jnp.einsum('ncl,cp->npl', x_ncl, w1), g1, b1))
    hp = jnp.pad(h, ((0, 0), (0, 0), (1, 1)))
    h2 = sum(jnp.einsum('ncl,cp->npl', hp[:, :, k:k + L], w2[k]) for k in range(3))
    h2 = relu(bn(h2, g2, b2))
    main = bn(jnp.einsum('ncl,cp->npl', h2, w3), g3, b3)
    sc = bn(jnp.einsum('ncl,cp->npl', x_ncl, ws), gs, bs)
    return relu(main + sc)


if __name__ == "__main__":
    key = jax.random.PRNGKey(0)
    N, in_planes, L = 2, 4, 16
    out_planes = 8
    planes = out_planes // 2  # expansion = 2

    ks = jax.random.split(key, 16)
    x = jax.random.normal(ks[0], (N, in_planes, L), jnp.float32)

    # conv weights stored already transposed to (Cin, Cout) / (k, Cin, Cout)
    w1 = 0.5 * jax.random.normal(ks[1], (in_planes, planes), jnp.float32)
    w2 = 0.5 * jax.random.normal(ks[2], (3, planes, planes), jnp.float32)
    w3 = 0.5 * jax.random.normal(ks[3], (planes, out_planes), jnp.float32)
    ws = 0.5 * jax.random.normal(ks[4], (in_planes, out_planes), jnp.float32)

    # BatchNorm affine params (stored as (1, C) for direct row-broadcast)
    g1 = 1.0 + 0.1 * jax.random.normal(ks[5], (1, planes), jnp.float32)
    b1 = 0.1 * jax.random.normal(ks[6], (1, planes), jnp.float32)
    g2 = 1.0 + 0.1 * jax.random.normal(ks[7], (1, planes), jnp.float32)
    b2 = 0.1 * jax.random.normal(ks[8], (1, planes), jnp.float32)
    g3 = 1.0 + 0.1 * jax.random.normal(ks[9], (1, out_planes), jnp.float32)
    b3 = 0.1 * jax.random.normal(ks[10], (1, out_planes), jnp.float32)
    gs = 1.0 + 0.1 * jax.random.normal(ks[11], (1, out_planes), jnp.float32)
    bs = 0.1 * jax.random.normal(ks[12], (1, out_planes), jnp.float32)

    params = (w1, g1, b1, w2, g2, b2, w3, g3, b3, ws, gs, bs)

    ref = reference(x, params)

    # Strict check on the f32 matmul path.  tile_rows=16 forces 2 row tiles so
    # the multi-tile grid and cross-tile BN-stats accumulation are exercised.
    out_f32 = jax.block_until_ready(
        bottleneck_forward(x, params, matmul_dtype=jnp.float32, tile_rows=16))
    assert out_f32.shape == (N, out_planes, L), out_f32.shape
    assert jnp.allclose(out_f32, ref, rtol=1e-4, atol=1e-4), \
        float(jnp.max(jnp.abs(out_f32 - ref)))

    # Default fast path: bf16 MXU operands / intermediates, f32 accumulation
    # and BN math (looser tolerance by construction).
    out_bf16 = jax.block_until_ready(
        bottleneck_forward(x, params, tile_rows=16))
    assert out_bf16.shape == (N, out_planes, L), out_bf16.shape
    assert jnp.allclose(out_bf16, ref, rtol=1e-1, atol=1e-1), \
        float(jnp.max(jnp.abs(out_bf16 - ref)))

    print("KERNEL_OK")
</pallas_src>

<mosaic_0001>
module attributes {stable_mosaic.version = 11 : i64} {
  func.func @_conv1_kernel(%arg0: i32, %arg1: memref<16x128xf32, #tpu.memory_space<vmem>>, %arg2: memref<128x128xf32, #tpu.memory_space<vmem>>, %arg3: memref<16x128xf32, #tpu.memory_space<vmem>>, %arg4: memref<1x2x128xf32, #tpu.memory_space<vmem>>) attributes {dimension_semantics = [#tpu.dimension_semantics<parallel>], iteration_bounds = array<i64: 2>, scalar_prefetch = 0 : i64, scratch_operands = 0 : i64, tpu.core_type = #tpu.core_type<tc>, window_params = [{transform_indices = @transform_0, window_bounds = array<i64: 16, 128>}, {pipeline_mode = #tpu.pipeline_mode<synchronous>, transform_indices = @transform_1, window_bounds = array<i64: 128, 128>}, {transform_indices = @transform_2, window_bounds = array<i64: 16, 128>}, {transform_indices = @transform_3, window_bounds = array<i64: 1, 2, 128>}]} {
    %c0 = arith.constant 0 : index
    %c0_0 = arith.constant 0 : index
    %0 = vector.load %arg1[%c0, %c0_0] : memref<16x128xf32, #tpu.memory_space<vmem>>, vector<16x128xf32>
    %c0_1 = arith.constant 0 : index
    %c0_2 = arith.constant 0 : index
    %1 = vector.load %arg2[%c0_1, %c0_2] : memref<128x128xf32, #tpu.memory_space<vmem>>, vector<128x128xf32>
    %cst = arith.constant dense<0.000000e+00> : vector<16x128xf32>
    %2 = tpu.matmul %0, %1, %cst {dimension_numbers = #tpu.dot_dimension_numbers<[1], [0], [0], [1], [0, 0, 1, 1], [], []>} : vector<16x128xf32>, vector<128x128xf32>, vector<16x128xf32> -> vector<16x128xf32>
    %c0_3 = arith.constant 0 : index
    %c0_4 = arith.constant 0 : index
    %3 = vector.load %arg3[%c0_3, %c0_4] : memref<16x128xf32, #tpu.memory_space<vmem>>, vector<16x128xf32>
    tpu.vector_store %arg3[%c0_3, %c0_4], %2 {strides = array<i32>} : memref<16x128xf32, #tpu.memory_space<vmem>>, vector<16x128xf32>,
    %cst_5 = arith.constant dense<0.000000e+00> : vector<128xf32>
    %4 = vector.multi_reduction <add>, %2, %cst_5 [0] : vector<16x128xf32> to vector<128xf32>
    %5 = vector.shape_cast %4 : vector<128xf32> to vector<1x128xf32>
    %6 = arith.mulf %2, %2 : vector<16x128xf32>
    %cst_6 = arith.constant dense<0.000000e+00> : vector<128xf32>
    %7 = vector.multi_reduction <add>, %6, %cst_6 [0] : vector<16x128xf32> to vector<128xf32>
    %8 = vector.shape_cast %7 : vector<128xf32> to vector<1x128xf32>
    %9 = tpu.concatenate %5, %8 in 0 : vector<1x128xf32>, vector<1x128xf32> -> vector<2x128xf32>
    %c0_7 = arith.constant 0 : index
    %c0_8 = arith.constant 0 : index
    %c0_9 = arith.constant 0 : index
    %10 = vector.load %arg4[%c0_7, %c0_8, %c0_9] : memref<1x2x128xf32, #tpu.memory_space<vmem>>, vector<1x2x128xf32>
    %11 = vector.shape_cast %10 : vector<1x2x128xf32> to vector<2x128xf32>
    %12 = vector.shape_cast %9 : vector<2x128xf32> to vector<1x2x128xf32>
    tpu.vector_store %arg4[%c0_7, %c0_8, %c0_9], %12 {strides = array<i32>} : memref<1x2x128xf32, #tpu.memory_space<vmem>>, vector<1x2x128xf32>,
    return
  }
  func.func @transform_0(%arg0: i32) -> (i32, i32) {
    %c0_i32 = arith.constant 0 : i32
    %c0_i32_0 = arith.constant 0 : i32
    return %arg0, %c0_i32 : i32, i32
  }
  func.func @transform_1(%arg0: i32) -> (i32, i32) {
    %c0_i32 = arith.constant 0 : i32
    %c0_i32_0 = arith.constant 0 : i32
    %c0_i32_1 = arith.constant 0 : i32
    return %c0_i32, %c0_i32_0 : i32, i32
  }
  func.func @transform_2(%arg0: i32) -> (i32, i32) {
    %c0_i32 = arith.constant 0 : i32
    %c0_i32_0 = arith.constant 0 : i32
    return %arg0, %c0_i32 : i32, i32
  }
  func.func @transform_3(%arg0: i32) -> (i32, i32, i32) {
    %c0_i32 = arith.constant 0 : i32
    %c0_i32_0 = arith.constant 0 : i32
    %c0_i32_1 = arith.constant 0 : i32
    return %arg0, %c0_i32, %c0_i32_0 : i32, i32, i32
  }
}

module attributes {stable_mosaic.version = 11 : i64} {
  func.func @_conv2_kernel(%arg0: i32, %arg1: memref<16x128xf32, #tpu.memory_space<vmem>>, %arg2: memref<1x128xf32, #tpu.memory_space<vmem>>, %arg3: memref<1x128xf32, #tpu.memory_space<vmem>>, %arg4: memref<384x128xf32, #tpu.memory_space<vmem>>, %arg5: memref<16x128xf32, #tpu.memory_space<vmem>>, %arg6: memref<1x2x128xf32, #tpu.memory_space<vmem>>, %arg7: memref<16x384xf32, #tpu.memory_space<vmem>>) attributes {dimension_semantics = [#tpu.dimension_semantics<parallel>], iteration_bounds = array<i64: 2>, scalar_prefetch = 0 : i64, scratch_operands = 1 : i64, tpu.core_type = #tpu.core_type<tc>, window_params = [{transform_indices = @transform_0, window_bounds = array<i64: 16, 128>}, {pipeline_mode = #tpu.pipeline_mode<synchronous>, transform_indices = @transform_1, window_bounds = array<i64: 1, 128>}, {pipeline_mode = #tpu.pipeline_mode<synchronous>, transform_indices = @transform_2, window_bounds = array<i64: 1, 128>}, {pipeline_mode = #tpu.pipeline_mode<synchronous>, transform_indices = @transform_3, window_bounds = array<i64: 384, 128>}, {transform_indices = @transform_4, window_bounds = array<i64: 16, 128>}, {transform_indices = @transform_5, window_bounds = array<i64: 1, 2, 128>}]} {
    %c0 = arith.constant 0 : index
    %c0_0 = arith.constant 0 : index
    %0 = vector.load %arg1[%c0, %c0_0] : memref<16x128xf32, #tpu.memory_space<vmem>>, vector<16x128xf32>
    %c0_1 = arith.constant 0 : index
    %c0_2 = arith.constant 0 : index
    %1 = vector.load %arg2[%c0_1, %c0_2] : memref<1x128xf32, #tpu.memory_space<vmem>>, vector<1x128xf32>
    %2 = vector.broadcast %1 : vector<1x128xf32> to vector<16x128xf32>
    %3 = arith.mulf %0, %2 : vector<16x128xf32>
    %c0_3 = arith.constant 0 : index
    %c0_4 = arith.constant 0 : index
    %4 = vector.load %arg3[%c0_3, %c0_4] : memref<1x128xf32, #tpu.memory_space<vmem>>, vector<1x128xf32>
    %5 = vector.broadcast %4 : vector<1x128xf32> to vector<16x128xf32>
    %6 = arith.addf %3, %5 : vector<16x128xf32>
    %cst = arith.constant 0.000000e+00 : f32
    %7 = vector.broadcast %cst : f32 to vector<16x128xf32>
    %8 = arith.maximumf %6, %7 : vector<16x128xf32>
    %9 = tpu.iota {dimensions = array<i32: 0>} : vector<16x1xi32>
    %c16_i32 = arith.constant 16 : i32
    %c0_i32 = arith.constant 0 : i32
    %10 = arith.cmpi eq, %c16_i32, %c0_i32 : i32
    %c1_i32 = arith.constant 1 : i32
    %11 = arith.select %10, %c1_i32, %c16_i32 : i32
    %12 = vector.broadcast %11 : i32 to vector<16x1xi32>
    %13 = arith.remsi %9, %12 : vector<16x1xi32>
    %c0_i32_5 = arith.constant 0 : i32
    %14 = vector.broadcast %c0_i32_5 : i32 to vector<16x1xi32>
    %15 = arith.cmpi ne, %13, %14 : vector<16x1xi32>
    %c0_i32_6 = arith.constant 0 : i32
    %16 = vector.broadcast %c0_i32_6 : i32 to vector<16x1xi32>
    %17 = arith.cmpi slt, %13, %16 : vector<16x1xi32>
    %c0_i32_7 = arith.constant 0 : i32
    %18 = arith.cmpi slt, %11, %c0_i32_7 : i32
    %19 = vector.broadcast %18 : i1 to vector<16x1xi1>
    %20 = vector.broadcast %19 : vector<16x1xi1> to vector<16x1xi1>
    %21 = arith.xori %17, %20 : vector<16x1xi1>
    %22 = arith.andi %21, %15 : vector<16x1xi1>
    %23 = vector.broadcast %11 : i32 to vector<16x1xi32>
    %24 = arith.addi %13, %23 : vector<16x1xi32>
    %25 = arith.select %22, %24, %13 : vector<16x1xi1>, vector<16x1xi32>
    %c0_i32_8 = arith.constant 0 : i32
    %26 = vector.broadcast %c0_i32_8 : i32 to vector<16x1xi32>
    %27 = arith.cmpi sgt, %25, %26 : vector<16x1xi32>
    %c1_i32_9 = arith.constant 1 : i32
    %28 = tpu.dynamic_rotate %8 by %c1_i32_9 dim 0 : vector<16x128xf32>, i32 -> vector<16x128xf32>
    %cst_10 = arith.constant 0.000000e+00 : f32
    %29 = vector.shape_cast %27 : vector<16x1xi1> to vector<16x1xi1>
    %30 = vector.broadcast %29 : vector<16x1xi1> to vector<16x128xi1>
    %31 = vector.broadcast %cst_10 : f32 to vector<16x128xf32>
    %32 = arith.select %30, %28, %31 : vector<16x128xi1>, vector<16x128xf32>
    %c15_i32 = arith.constant 15 : i32
    %33 = vector.broadcast %c15_i32 : i32 to vector<16x1xi32>
    %34 = arith.cmpi slt, %25, %33 : vector<16x1xi32>
    %c15_i32_11 = arith.constant 15 : i32
    %35 = tpu.dynamic_rotate %8 by %c15_i32_11 dim 0 : vector<16x128xf32>, i32 -> vector<16x128xf32>
    %cst_12 = arith.constant 0.000000e+00 : f32
    %36 = vector.shape_cast %34 : vector<16x1xi1> to vector<16x1xi1>
    %37 = vector.broadcast %36 : vector<16x1xi1> to vector<16x128xi1>
    %38 = vector.broadcast %cst_12 : f32 to vector<16x128xf32>
    %39 = arith.select %37, %35, %38 : vector<16x128xi1>, vector<16x128xf32>
    %c0_13 = arith.constant 0 : index
    %c0_14 = arith.constant 0 : index
    %40 = vector.load %arg7[%c0_13, %c0_14] : memref<16x384xf32, #tpu.memory_space<vmem>>, vector<16x128xf32>
    tpu.vector_store %arg7[%c0_13, %c0_14], %32 {strides = array<i32>} : memref<16x384xf32, #tpu.memory_space<vmem>>, vector<16x128xf32>,
    %c0_15 = arith.constant 0 : index
    %c128 = arith.constant 128 : index
    %41 = vector.load %arg7[%c0_15, %c128] : memref<16x384xf32, #tpu.memory_space<vmem>>, vector<16x128xf32>
    tpu.vector_store %arg7[%c0_15, %c128], %8 {strides = array<i32>} : memref<16x384xf32, #tpu.memory_space<vmem>>, vector<16x128xf32>,
    %c0_16 = arith.constant 0 : index
    %c256 = arith.constant 256 : index
    %42 = vector.load %arg7[%c0_16, %c256] : memref<16x384xf32, #tpu.memory_space<vmem>>, vector<16x128xf32>
    tpu.vector_store %arg7[%c0_16, %c256], %39 {strides = array<i32>} : memref<16x384xf32, #tpu.memory_space<vmem>>, vector<16x128xf32>,
    %c0_17 = arith.constant 0 : index
    %c0_18 = arith.constant 0 : index
    %43 = vector.load %arg7[%c0_17, %c0_18] : memref<16x384xf32, #tpu.memory_space<vmem>>, vector<16x384xf32>
    %c0_19 = arith.constant 0 : index
    %c0_20 = arith.constant 0 : index
    %44 = vector.load %arg4[%c0_19, %c0_20] : memref<384x128xf32, #tpu.memory_space<vmem>>, vector<384x128xf32>
    %cst_21 = arith.constant dense<0.000000e+00> : vector<16x128xf32>
    %45 = tpu.matmul %43, %44, %cst_21 {dimension_numbers = #tpu.dot_dimension_numbers<[1], [0], [0], [1], [0, 0, 1, 1], [], []>} : vector<16x384xf32>, vector<384x128xf32>, vector<16x128xf32> -> vector<16x128xf32>
    %c0_22 = arith.constant 0 : index
    %c0_23 = arith.constant 0 : index
    %46 = vector.load %arg5[%c0_22, %c0_23] : memref<16x128xf32, #tpu.memory_space<vmem>>, vector<16x128xf32>
    tpu.vector_store %arg5[%c0_22, %c0_23], %45 {strides = array<i32>} : memref<16x128xf32, #tpu.memory_space<vmem>>, vector<16x128xf32>,
    %cst_24 = arith.constant dense<0.000000e+00> : vector<128xf32>
    %47 = vector.multi_reduction <add>, %45, %cst_24 [0] : vector<16x128xf32> to vector<128xf32>
    %48 = vector.shape_cast %47 : vector<128xf32> to vector<1x128xf32>
    %49 = arith.mulf %45, %45 : vector<16x128xf32>
    %cst_25 = arith.constant dense<0.000000e+00> : vector<128xf32>
    %50 = vector.multi_reduction <add>, %49, %cst_25 [0] : vector<16x128xf32> to vector<128xf32>
    %51 = vector.shape_cast %50 : vector<128xf32> to vector<1x128xf32>
    %52 = tpu.concatenate %48, %51 in 0 : vector<1x128xf32>, vector<1x128xf32> -> vector<2x128xf32>
    %c0_26 = arith.constant 0 : index
    %c0_27 = arith.constant 0 : index
    %c0_28 = arith.constant 0 : index
    %53 = vector.load %arg6[%c0_26, %c0_27, %c0_28] : memref<1x2x128xf32, #tpu.memory_space<vmem>>, vector<1x2x128xf32>
    %54 = vector.shape_cast %53 : vector<1x2x128xf32> to vector<2x128xf32>
    %55 = vector.shape_cast %52 : vector<2x128xf32> to vector<1x2x128xf32>
    tpu.vector_store %arg6[%c0_26, %c0_27, %c0_28], %55 {strides = array<i32>} : memref<1x2x128xf32, #tpu.memory_space<vmem>>, vector<1x2x128xf32>,
    return
  }
  func.func @transform_0(%arg0: i32) -> (i32, i32) {
    %c0_i32 = arith.constant 0 : i32
    %c0_i32_0 = arith.constant 0 : i32
    return %arg0, %c0_i32 : i32, i32
  }
  func.func @transform_1(%arg0: i32) -> (i32, i32) {
    %c0_i32 = arith.constant 0 : i32
    %c0_i32_0 = arith.constant 0 : i32
    %c0_i32_1 = arith.constant 0 : i32
    return %c0_i32, %c0_i32_0 : i32, i32
  }
  func.func @transform_2(%arg0: i32) -> (i32, i32) {
    %c0_i32 = arith.constant 0 : i32
    %c0_i32_0 = arith.constant 0 : i32
    %c0_i32_1 = arith.constant 0 : i32
    return %c0_i32, %c0_i32_0 : i32, i32
  }
  func.func @transform_3(%arg0: i32) -> (i32, i32) {
    %c0_i32 = arith.constant 0 : i32
    %c0_i32_0 = arith.constant 0 : i32
    %c0_i32_1 = arith.constant 0 : i32
    return %c0_i32, %c0_i32_0 : i32, i32
  }
  func.func @transform_4(%arg0: i32) -> (i32, i32) {
    %c0_i32 = arith.constant 0 : i32
    %c0_i32_0 = arith.constant 0 : i32
    return %arg0, %c0_i32 : i32, i32
  }
  func.func @transform_5(%arg0: i32) -> (i32, i32, i32) {
    %c0_i32 = arith.constant 0 : i32
    %c0_i32_0 = arith.constant 0 : i32
    %c0_i32_1 = arith.constant 0 : i32
    return %arg0, %c0_i32, %c0_i32_0 : i32, i32, i32
  }
}

module attributes {stable_mosaic.version = 11 : i64} {
  func.func @_conv3_kernel(%arg0: i32, %arg1: memref<16x128xf32, #tpu.memory_space<vmem>>, %arg2: memref<1x128xf32, #tpu.memory_space<vmem>>, %arg3: memref<1x128xf32, #tpu.memory_space<vmem>>, %arg4: memref<128x128xf32, #tpu.memory_space<vmem>>, %arg5: memref<16x128xf32, #tpu.memory_space<vmem>>, %arg6: memref<128x128xf32, #tpu.memory_space<vmem>>, %arg7: memref<16x128xf32, #tpu.memory_space<vmem>>, %arg8: memref<16x128xf32, #tpu.memory_space<vmem>>, %arg9: memref<1x2x128xf32, #tpu.memory_space<vmem>>, %arg10: memref<1x2x128xf32, #tpu.memory_space<vmem>>) attributes {dimension_semantics = [#tpu.dimension_semantics<parallel>], iteration_bounds = array<i64: 2>, scalar_prefetch = 0 : i64, scratch_operands = 0 : i64, tpu.core_type = #tpu.core_type<tc>, window_params = [{transform_indices = @transform_0, window_bounds = array<i64: 16, 128>}, {pipeline_mode = #tpu.pipeline_mode<synchronous>, transform_indices = @transform_1, window_bounds = array<i64: 1, 128>}, {pipeline_mode = #tpu.pipeline_mode<synchronous>, transform_indices = @transform_2, window_bounds = array<i64: 1, 128>}, {pipeline_mode = #tpu.pipeline_mode<synchronous>, transform_indices = @transform_3, window_bounds = array<i64: 128, 128>}, {transform_indices = @transform_4, window_bounds = array<i64: 16, 128>}, {pipeline_mode = #tpu.pipeline_mode<synchronous>, transform_indices = @transform_5, window_bounds = array<i64: 128, 128>}, {transform_indices = @transform_6, window_bounds = array<i64: 16, 128>}, {transform_indices = @transform_7, window_bounds = array<i64: 16, 128>}, {transform_indices = @transform_8, window_bounds = array<i64: 1, 2, 128>}, {transform_indices = @transform_9, window_bounds = array<i64: 1, 2, 128>}]} {
    %c0 = arith.constant 0 : index
    %c0_0 = arith.constant 0 : index
    %0 = vector.load %arg1[%c0, %c0_0] : memref<16x128xf32, #tpu.memory_space<vmem>>, vector<16x128xf32>
    %c0_1 = arith.constant 0 : index
    %c0_2 = arith.constant 0 : index
    %1 = vector.load %arg2[%c0_1, %c0_2] : memref<1x128xf32, #tpu.memory_space<vmem>>, vector<1x128xf32>
    %2 = vector.broadcast %1 : vector<1x128xf32> to vector<16x128xf32>
    %3 = arith.mulf %0, %2 : vector<16x128xf32>
    %c0_3 = arith.constant 0 : index
    %c0_4 = arith.constant 0 : index
    %4 = vector.load %arg3[%c0_3, %c0_4] : memref<1x128xf32, #tpu.memory_space<vmem>>, vector<1x128xf32>
    %5 = vector.broadcast %4 : vector<1x128xf32> to vector<16x128xf32>
    %6 = arith.addf %3, %5 : vector<16x128xf32>
    %cst = arith.constant 0.000000e+00 : f32
    %7 = vector.broadcast %cst : f32 to vector<16x128xf32>
    %8 = arith.maximumf %6, %7 : vector<16x128xf32>
    %c0_5 = arith.constant 0 : index
    %c0_6 = arith.constant 0 : index
    %9 = vector.load %arg4[%c0_5, %c0_6] : memref<128x128xf32, #tpu.memory_space<vmem>>, vector<128x128xf32>
    %cst_7 = arith.constant dense<0.000000e+00> : vector<16x128xf32>
    %10 = tpu.matmul %8, %9, %cst_7 {dimension_numbers = #tpu.dot_dimension_numbers<[1], [0], [0], [1], [0, 0, 1, 1], [], []>} : vector<16x128xf32>, vector<128x128xf32>, vector<16x128xf32> -> vector<16x128xf32>
    %c0_8 = arith.constant 0 : index
    %c0_9 = arith.constant 0 : index
    %11 = vector.load %arg5[%c0_8, %c0_9] : memref<16x128xf32, #tpu.memory_space<vmem>>, vector<16x128xf32>
    %c0_10 = arith.constant 0 : index
    %c0_11 = arith.constant 0 : index
    %12 = vector.load %arg6[%c0_10, %c0_11] : memref<128x128xf32, #tpu.memory_space<vmem>>, vector<128x128xf32>
    %cst_12 = arith.constant dense<0.000000e+00> : vector<16x128xf32>
    %13 = tpu.matmul %11, %12, %cst_12 {dimension_numbers = #tpu.dot_dimension_numbers<[1], [0], [0], [1], [0, 0, 1, 1], [], []>} : vector<16x128xf32>, vector<128x128xf32>, vector<16x128xf32> -> vector<16x128xf32>
    %c0_13 = arith.constant 0 : index
    %c0_14 = arith.constant 0 : index
    %14 = vector.load %arg7[%c0_13, %c0_14] : memref<16x128xf32, #tpu.memory_space<vmem>>, vector<16x128xf32>
    tpu.vector_store %arg7[%c0_13, %c0_14], %10 {strides = array<i32>} : memref<16x128xf32, #tpu.memory_space<vmem>>, vector<16x128xf32>,
    %c0_15 = arith.constant 0 : index
    %c0_16 = arith.constant 0 : index
    %15 = vector.load %arg8[%c0_15, %c0_16] : memref<16x128xf32, #tpu.memory_space<vmem>>, vector<16x128xf32>
    tpu.vector_store %arg8[%c0_15, %c0_16], %13 {strides = array<i32>} : memref<16x128xf32, #tpu.memory_space<vmem>>, vector<16x128xf32>,
    %cst_17 = arith.constant dense<0.000000e+00> : vector<128xf32>
    %16 = vector.multi_reduction <add>, %10, %cst_17 [0] : vector<16x128xf32> to vector<128xf32>
    %17 = vector.shape_cast %16 : vector<128xf32> to vector<1x128xf32>
    %18 = arith.mulf %10, %10 : vector<16x128xf32>
    %cst_18 = arith.constant dense<0.000000e+00> : vector<128xf32>
    %19 = vector.multi_reduction <add>, %18, %cst_18 [0] : vector<16x128xf32> to vector<128xf32>
    %20 = vector.shape_cast %19 : vector<128xf32> to vector<1x128xf32>
    %21 = tpu.concatenate %17, %20 in 0 : vector<1x128xf32>, vector<1x128xf32> -> vector<2x128xf32>
    %c0_19 = arith.constant 0 : index
    %c0_20 = arith.constant 0 : index
    %c0_21 = arith.constant 0 : index
    %22 = vector.load %arg9[%c0_19, %c0_20, %c0_21] : memref<1x2x128xf32, #tpu.memory_space<vmem>>, vector<1x2x128xf32>
    %23 = vector.shape_cast %22 : vector<1x2x128xf32> to vector<2x128xf32>
    %24 = vector.shape_cast %21 : vector<2x128xf32> to vector<1x2x128xf32>
    tpu.vector_store %arg9[%c0_19, %c0_20, %c0_21], %24 {strides = array<i32>} : memref<1x2x128xf32, #tpu.memory_space<vmem>>, vector<1x2x128xf32>,
    %cst_22 = arith.constant dense<0.000000e+00> : vector<128xf32>
    %25 = vector.multi_reduction <add>, %13, %cst_22 [0] : vector<16x128xf32> to vector<128xf32>
    %26 = vector.shape_cast %25 : vector<128xf32> to vector<1x128xf32>
    %27 = arith.mulf %13, %13 : vector<16x128xf32>
    %cst_23 = arith.constant dense<0.000000e+00> : vector<128xf32>
    %28 = vector.multi_reduction <add>, %27, %cst_23 [0] : vector<16x128xf32> to vector<128xf32>
    %29 = vector.shape_cast %28 : vector<128xf32> to vector<1x128xf32>
    %30 = tpu.concatenate %26, %29 in 0 : vector<1x128xf32>, vector<1x128xf32> -> vector<2x128xf32>
    %c0_24 = arith.constant 0 : index
    %c0_25 = arith.constant 0 : index
    %c0_26 = arith.constant 0 : index
    %31 = vector.load %arg10[%c0_24, %c0_25, %c0_26] : memref<1x2x128xf32, #tpu.memory_space<vmem>>, vector<1x2x128xf32>
    %32 = vector.shape_cast %31 : vector<1x2x128xf32> to vector<2x128xf32>
    %33 = vector.shape_cast %30 : vector<2x128xf32> to vector<1x2x128xf32>
    tpu.vector_store %arg10[%c0_24, %c0_25, %c0_26], %33 {strides = array<i32>} : memref<1x2x128xf32, #tpu.memory_space<vmem>>, vector<1x2x128xf32>,
    return
  }
  func.func @transform_0(%arg0: i32) -> (i32, i32) {
    %c0_i32 = arith.constant 0 : i32
    %c0_i32_0 = arith.constant 0 : i32
    return %arg0, %c0_i32 : i32, i32
  }
  func.func @transform_1(%arg0: i32) -> (i32, i32) {
    %c0_i32 = arith.constant 0 : i32
    %c0_i32_0 = arith.constant 0 : i32
    %c0_i32_1 = arith.constant 0 : i32
    return %c0_i32, %c0_i32_0 : i32, i32
  }
  func.func @transform_2(%arg0: i32) -> (i32, i32) {
    %c0_i32 = arith.constant 0 : i32
    %c0_i32_0 = arith.constant 0 : i32
    %c0_i32_1 = arith.constant 0 : i32
    return %c0_i32, %c0_i32_0 : i32, i32
  }
  func.func @transform_3(%arg0: i32) -> (i32, i32) {
    %c0_i32 = arith.constant 0 : i32
    %c0_i32_0 = arith.constant 0 : i32
    %c0_i32_1 = arith.constant 0 : i32
    return %c0_i32, %c0_i32_0 : i32, i32
  }
  func.func @transform_4(%arg0: i32) -> (i32, i32) {
    %c0_i32 = arith.constant 0 : i32
    %c0_i32_0 = arith.constant 0 : i32
    return %arg0, %c0_i32 : i32, i32
  }
  func.func @transform_5(%arg0: i32) -> (i32, i32) {
    %c0_i32 = arith.constant 0 : i32
    %c0_i32_0 = arith.constant 0 : i32
    %c0_i32_1 = arith.constant 0 : i32
    return %c0_i32, %c0_i32_0 : i32, i32
  }
  func.func @transform_6(%arg0: i32) -> (i32, i32) {
    %c0_i32 = arith.constant 0 : i32
    %c0_i32_0 = arith.constant 0 : i32
    return %arg0, %c0_i32 : i32, i32
  }
  func.func @transform_7(%arg0: i32) -> (i32, i32) {
    %c0_i32 = arith.constant 0 : i32
    %c0_i32_0 = arith.constant 0 : i32
    return %arg0, %c0_i32 : i32, i32
  }
  func.func @transform_8(%arg0: i32) -> (i32, i32, i32) {
    %c0_i32 = arith.constant 0 : i32
    %c0_i32_0 = arith.constant 0 : i32
    %c0_i32_1 = arith.constant 0 : i32
    return %arg0, %c0_i32, %c0_i32_0 : i32, i32, i32
  }
  func.func @transform_9(%arg0: i32) -> (i32, i32, i32) {
    %c0_i32 = arith.constant 0 : i32
    %c0_i32_0 = arith.constant 0 : i32
    %c0_i32_1 = arith.constant 0 : i32
    return %arg0, %c0_i32, %c0_i32_0 : i32, i32, i32
  }
}

module attributes {stable_mosaic.version = 11 : i64} {
  func.func @_finalize_kernel(%arg0: i32, %arg1: memref<16x128xf32, #tpu.memory_space<vmem>>, %arg2: memref<16x128xf32, #tpu.memory_space<vmem>>, %arg3: memref<1x128xf32, #tpu.memory_space<vmem>>, %arg4: memref<1x128xf32, #tpu.memory_space<vmem>>, %arg5: memref<1x128xf32, #tpu.memory_space<vmem>>, %arg6: memref<1x128xf32, #tpu.memory_space<vmem>>, %arg7: memref<16x128xf32, #tpu.memory_space<vmem>>) attributes {dimension_semantics = [#tpu.dimension_semantics<parallel>], iteration_bounds = array<i64: 2>, scalar_prefetch = 0 : i64, scratch_operands = 0 : i64, tpu.core_type = #tpu.core_type<tc>, window_params = [{transform_indices = @transform_0, window_bounds = array<i64: 16, 128>}, {transform_indices = @transform_1, window_bounds = array<i64: 16, 128>}, {pipeline_mode = #tpu.pipeline_mode<synchronous>, transform_indices = @transform_2, window_bounds = array<i64: 1, 128>}, {pipeline_mode = #tpu.pipeline_mode<synchronous>, transform_indices = @transform_3, window_bounds = array<i64: 1, 128>}, {pipeline_mode = #tpu.pipeline_mode<synchronous>, transform_indices = @transform_4, window_bounds = array<i64: 1, 128>}, {pipeline_mode = #tpu.pipeline_mode<synchronous>, transform_indices = @transform_5, window_bounds = array<i64: 1, 128>}, {transform_indices = @transform_6, window_bounds = array<i64: 16, 128>}]} {
    %c0 = arith.constant 0 : index
    %c0_0 = arith.constant 0 : index
    %0 = vector.load %arg1[%c0, %c0_0] : memref<16x128xf32, #tpu.memory_space<vmem>>, vector<16x128xf32>
    %c0_1 = arith.constant 0 : index
    %c0_2 = arith.constant 0 : index
    %1 = vector.load %arg3[%c0_1, %c0_2] : memref<1x128xf32, #tpu.memory_space<vmem>>, vector<1x128xf32>
    %2 = vector.broadcast %1 : vector<1x128xf32> to vector<16x128xf32>
    %3 = arith.mulf %0, %2 : vector<16x128xf32>
    %c0_3 = arith.constant 0 : index
    %c0_4 = arith.constant 0 : index
    %4 = vector.load %arg4[%c0_3, %c0_4] : memref<1x128xf32, #tpu.memory_space<vmem>>, vector<1x128xf32>
    %5 = vector.broadcast %4 : vector<1x128xf32> to vector<16x128xf32>
    %6 = arith.addf %3, %5 : vector<16x128xf32>
    %c0_5 = arith.constant 0 : index
    %c0_6 = arith.constant 0 : index
    %7 = vector.load %arg2[%c0_5, %c0_6] : memref<16x128xf32, #tpu.memory_space<vmem>>, vector<16x128xf32>
    %c0_7 = arith.constant 0 : index
    %c0_8 = arith.constant 0 : index
    %8 = vector.load %arg5[%c0_7, %c0_8] : memref<1x128xf32, #tpu.memory_space<vmem>>, vector<1x128xf32>
    %9 = vector.broadcast %8 : vector<1x128xf32> to vector<16x128xf32>
    %10 = arith.mulf %7, %9 : vector<16x128xf32>
    %c0_9 = arith.constant 0 : index
    %c0_10 = arith.constant 0 : index
    %11 = vector.load %arg6[%c0_9, %c0_10] : memref<1x128xf32, #tpu.memory_space<vmem>>, vector<1x128xf32>
    %12 = vector.broadcast %11 : vector<1x128xf32> to vector<16x128xf32>
    %13 = arith.addf %10, %12 : vector<16x128xf32>
    %14 = arith.addf %6, %13 : vector<16x128xf32>
    %cst = arith.constant 0.000000e+00 : f32
    %15 = vector.broadcast %cst : f32 to vector<16x128xf32>
    %16 = arith.maximumf %14, %15 : vector<16x128xf32>
    %c0_11 = arith.constant 0 : index
    %c0_12 = arith.constant 0 : index
    %17 = vector.load %arg7[%c0_11, %c0_12] : memref<16x128xf32, #tpu.memory_space<vmem>>, vector<16x128xf32>
    tpu.vector_store %arg7[%c0_11, %c0_12], %16 {strides = array<i32>} : memref<16x128xf32, #tpu.memory_space<vmem>>, vector<16x128xf32>,
    return
  }
  func.func @transform_0(%arg0: i32) -> (i32, i32) {
    %c0_i32 = arith.constant 0 : i32
    %c0_i32_0 = arith.constant 0 : i32
    return %arg0, %c0_i32 : i32, i32
  }
  func.func @transform_1(%arg0: i32) -> (i32, i32) {
    %c0_i32 = arith.constant 0 : i32
    %c0_i32_0 = arith.constant 0 : i32
    return %arg0, %c0_i32 : i32, i32
  }
  func.func @transform_2(%arg0: i32) -> (i32, i32) {
    %c0_i32 = arith.constant 0 : i32
    %c0_i32_0 = arith.constant 0 : i32
    %c0_i32_1 = arith.constant 0 : i32
    return %c0_i32, %c0_i32_0 : i32, i32
  }
  func.func @transform_3(%arg0: i32) -> (i32, i32) {
    %c0_i32 = arith.constant 0 : i32
    %c0_i32_0 = arith.constant 0 : i32
    %c0_i32_1 = arith.constant 0 : i32
    return %c0_i32, %c0_i32_0 : i32, i32
  }
  func.func @transform_4(%arg0: i32) -> (i32, i32) {
    %c0_i32 = arith.constant 0 : i32
    %c0_i32_0 = arith.constant 0 : i32
    %c0_i32_1 = arith.constant 0 : i32
    return %c0_i32, %c0_i32_0 : i32, i32
  }
  func.func @transform_5(%arg0: i32) -> (i32, i32) {
    %c0_i32 = arith.constant 0 : i32
    %c0_i32_0 = arith.constant 0 : i32
    %c0_i32_1 = arith.constant 0 : i32
    return %c0_i32, %c0_i32_0 : i32, i32
  }
  func.func @transform_6(%arg0: i32) -> (i32, i32) {
    %c0_i32 = arith.constant 0 : i32
    %c0_i32_0 = arith.constant 0 : i32
    return %arg0, %c0_i32 : i32, i32
  }
}

</mosaic_0001>

<bundles_post_ra>
// kernel: bottleneck_forward.4
= control target key start
LH: loop header
LB: loop body
LE: loop exit
PB: predicated region body
PF: predicated region fallthrough
CT: control target
= control target key end

     0   :  { %s487_s12 = smov 0   ;;  %s571_s0 = inlined_call_operand.vmem [shape: f32[32,128], index: 0, kind: input, shape index: {}]   ;;  %s572_s1 = inlined_call_operand.vmem [shape: f32[128,128], index: 1, kind: input, shape index: {}]   ;;  %s573_s2 = inlined_call_operand.vmem [shape: f32[32,128], index: 2, kind: output, shape index: {0}]   ;;  %s574_s3 = inlined_call_operand.vmem [shape: f32[2,2,128], index: 3, kind: output, shape index: {1}]  }
   0x1 LB: > { %s493_s13 = sadd.s32 4294967295, %s465_s12   ;;  %p390_p0 = scmp.ge.s32.totalorder %s465_s12, 1  ;;  %s465_s12 = sphi %s487_s12, %s14_s12  }
   0x2   : > { %p141_p1 = scmp.lt.s32.totalorder %s465_s12, 3 }
   0x4   : > { %p142_p2 = pnand %p390_p0, %p141_p1 }
   0x5   : > { %s391_s18 = sshll.u32 (!%p142_p2), %s493_s13, 1  ;;  %p181_p4 = scmp.lt.s32.totalorder (!%p142_p2), %s493_s13, 1 }
   0x6   : > { %145 = sbr.rel (%p142_p2) target bundleno = 257 (0x101), region = 28  ;;  %p170_p3 = scmp.lt.s32.totalorder (!%p142_p2), %s391_s18, 3 }
   0xb   : > { %v202_v0 = vld [vmem:[%s572_s1 + $0x78] sm:$0xff]  ;;  %v201_v1 = vld [vmem:[%s572_s1 + $0x70] sm:$0xff]  ;;  %v200_v2 = vld [vmem:[%s572_s1 + $0x68] sm:$0xff]  ;;  %s576_s18 = smov (!%p170_p3, %s391_s18), 3  ;;  %s578_s13 = smov (!%p181_p4, %s493_s13), 1  ;;  %vm296_vm0 = vcmask 1040384  }
   0xc   : > { %416 = vmatprep.subr.mxu0 %v202_v0  ;;  %v199_v3 = vld [vmem:[%s572_s1 + $0x60] sm:$0xff]  ;;  %s392_s23 = sshll.u32 %s576_s18, 3  ;;  %v198_v4 = vld [vmem:[%s572_s1 + $0x58] sm:$0xff]  ;;  %v197_v6 = vld [vmem:[%s572_s1 + $0x50] sm:$0xff]  ;;  %s395_s18 = sshll.u32 %s578_s13, 1 }
   0xd   : > { %417 = vmatpush3.msra.mxu0 %v202_v0  ;;  %s521_s28 = scalar_lea.vmem %s571_s0, %s392_s23  ;;  %v196_v7 = vld [vmem:[%s572_s1 + $0x48] sm:$0xff]  ;;  %v195_v8 = vld [vmem:[%s572_s1 + $0x40] sm:$0xff]  ;;  %v194_v9 = vld [vmem:[%s572_s1 + $0x38] sm:$0xff]  ;;  %s179_s4 = scalar_lea.vmem %s573_s2, %s392_s23 }
   0xe   : > { %418 = vmatprep.subr.mxu0 %v201_v1  ;;  %v185_v5 = vld [vmem:[%s521_s28] sm:$0xff]  ;;  %v193_v10 = vld [vmem:[%s572_s1 + $0x30] sm:$0xff]  ;;  %v192_v11 = vld [vmem:[%s572_s1 + $0x28] sm:$0xff]  ;;  %s184_s5 = scalar_lea.vmem %s574_s3, %s395_s18 }
   0xf   : > { %419 = vmatpush3.msra.mxu0 %v201_v1  ;;  %448 = vmatprep.mubr.f32.mxu0 %v185_v5  ;;  %v191_v12 = vld [vmem:[%s572_s1 + $0x20] sm:$0xff]  ;;  %v190_v13 = vld [vmem:[%s572_s1 + $0x18] sm:$0xff]  ;;  %v189_v14 = vld [vmem:[%s572_s1 + $0x10] sm:$0xff] }
  0x10   : > { %420 = vmatprep.subr.mxu0 %v200_v2  ;;  %v188_v15 = vld [vmem:[%s572_s1 + $0x8] sm:$0xff]  ;;  %v187_v16 = vld [vmem:[%s572_s1] sm:$0xff] }
  0x11   : > { %421 = vmatpush3.msra.mxu0 %v200_v2  ;;  %v186_v17 = vld [vmem:[%s521_s28 + $0x8] sm:$0xff] }
  0x12   : > { %422 = vmatprep.subr.mxu0 %v199_v3 }
  0x13   : > { %423 = vmatpush3.msra.mxu0 %v199_v3 }
  0x14   : > { %424 = vmatprep.subr.mxu0 %v198_v4 }
  0x15   : > { %425 = vmatpush3.msra.mxu0 %v198_v4 }
  0x16   : > { %426 = vmatprep.subr.mxu0 %v197_v6 }
  0x17   : > { %427 = vmatpush3.msra.mxu0 %v197_v6 }
  0x18   : > { %428 = vmatprep.subr.mxu0 %v196_v7 }
  0x19   : > { %429 = vmatpush3.msra.mxu0 %v196_v7 }
  0x1a   : > { %430 = vmatprep.subr.mxu0 %v195_v8 }
  0x1b   : > { %431 = vmatpush3.msra.mxu0 %v195_v8 }
  0x1c   : > { %432 = vmatprep.subr.mxu0 %v194_v9 }
  0x1d   : > { %433 = vmatpush3.msra.mxu0 %v194_v9 }
  0x1e   : > { %434 = vmatprep.subr.mxu0 %v193_v10 }
  0x1f   : > { %435 = vmatpush3.msra.mxu0 %v193_v10 }
  0x20   : > { %436 = vmatprep.subr.mxu0 %v192_v11 }
  0x21   : > { %437 = vmatpush3.msra.mxu0 %v192_v11 }
  0x22   : > { %438 = vmatprep.subr.mxu0 %v191_v12 }
  0x23   : > { %439 = vmatpush3.msra.mxu0 %v191_v12 }
  0x24   : > { %440 = vmatprep.subr.mxu0 %v190_v13 }
  0x25   : > { %441 = vmatpush3.msra.mxu0 %v190_v13 }
  0x26   : > { %442 = vmatprep.subr.mxu0 %v189_v14 }
  0x27   : > { %443 = vmatpush3.msra.mxu0 %v189_v14 }
  0x28   : > { %444 = vmatprep.subr.mxu0 %v188_v15 }
  0x29   : > { %445 = vmatpush3.msra.mxu0 %v188_v15 }
  0x2a   : > { %446 = vmatprep.subr.mxu0 %v187_v16 }
  0x2b   : > { %447 = vmatpush3.msra.mxu0 %v187_v16 }
  0x2c   : > { %449 = vmatmul.mubr.f32.vlgmr.msra.gmra.mxu0 %v186_v17 }
  0xec   : > { %v450_v18 = vpop.f32.mrf.mxu0 }
  0xed   : > { %v288_v20 = vmul.f32 %v450_v18, %v450_v18  ;;  %279 = vst [vmem:[%s179_s4 + $0x8] sm:$0xff] %v450_v18 }
  0xee   : > { %v269_v19 = vpop.f32.mrf.mxu0 }
  0xef   : > { %278 = vst [vmem:[%s179_s4] sm:$0xff] %v269_v19  ;;  %v280_v21 = vadd.f32 %v450_v18, %v269_v19  ;;  %v287_v22 = vmul.f32 %v269_v19, %v269_v19 }
  0xf1   : > { %v281_v23 = vrot.slane %v280_v21, 4  ;;  %v289_v24 = vadd.f32 %v288_v20, %v287_v22 }
  0xf3   : > { %v282_v25 = vadd.f32 %v281_v23, %v280_v21  ;;  %v290_v26 = vrot.slane %v289_v24, 4 }
  0xf5   : > { %v283_v27 = vrot.slane %v282_v25, 2  ;;  %v291_v28 = vadd.f32 %v290_v26, %v289_v24 }
  0xf7   : > { %v284_v29 = vadd.f32 %v283_v27, %v282_v25  ;;  %v292_v30 = vrot.slane %v291_v28, 2 }
  0xf9   : > { %v285_v31 = vrot.slane %v284_v29, 1  ;;  %v293_v32 = vadd.f32 %v292_v30, %v291_v28 }
  0xfb   : > { %v294_v33 = vrot.slane %v293_v32, 1  ;;  %v286_v34 = vadd.f32 %v285_v31, %v284_v29 }
  0xfd   : > { %v295_v35 = vadd.f32 %v294_v33, %v293_v32 }
  0xff   : > { %v297_v36 = vsel %vm296_vm0, %v286_v34, %v295_v35 }
 0x100   : > { %298 = vst [vmem:[%s184_s5] sm:$0x3] %v297_v36 }
 0x101 PF: > { %s14_s12 = sadd.s32 1, %s465_s12  }
 0x102   : > { %p11_p5 = scmp.ge.s32.totalorder %s14_s12, 4  }
 0x104   :  { %13 = sbr.rel (!%p11_p5) target bundleno = 1 (0x1), region = 70 }

// kernel: bottleneck_forward.7
= control target key start
LH: loop header
LB: loop body
LE: loop exit
PB: predicated region body
PF: predicated region fallthrough
CT: control target
= control target key end

     0   :  { %s459_s21 = smov 0   ;;  %s491_s0 = inlined_call_operand.vmem [shape: f32[32,128], index: 0, kind: input, shape index: {}]   ;;  %s492_s1 = inlined_call_operand.vmem [shape: f32[32,128], index: 1, kind: input, shape index: {}]   ;;  %s493_s2 = inlined_call_operand.vmem [shape: f32[1,128], index: 2, kind: input, shape index: {}]   ;;  %s494_s3 = inlined_call_operand.vmem [shape: f32[1,128], index: 3, kind: input, shape index: {}]   ;;  %s495_s4 = inlined_call_operand.vmem [shape: f32[1,128], index: 4, kind: input, shape index: {}]   ;;  %s496_s5 = inlined_call_operand.vmem [shape: f32[1,128], index: 5, kind: input, shape index: {}]   ;;  %s497_s6 = inlined_call_operand.vmem [shape: f32[32,128], index: 6, kind: output, shape index: {}]  }
   0x1 LB: > { %s391_s22 = sadd.s32 4294967295, %s422_s21   ;;  %p395_p0 = scmp.ge.s32.totalorder %s422_s21, 1  ;;  %s422_s21 = sphi %s459_s21, %s16_s21  }
   0x2   : > { %p224_p1 = scmp.lt.s32.totalorder %s422_s21, 3 }
   0x4   : > { %p225_p2 = pnand %p395_p0, %p224_p1 }
   0x5   : > { %s396_s23 = sshll.u32 (!%p225_p2), %s391_s22, 1 }
   0x6   : > { %228 = sbr.rel (%p225_p2) target bundleno = 26 (0x1a), region = 44  ;;  %p260_p3 = scmp.lt.s32.totalorder (!%p225_p2), %s396_s23, 3 }
   0xb   : > { %s499_s23 = smov (!%p260_p3, %s396_s23), 3  ;;  %v402_v0 = vld [vmem:[%s493_s2] ss:$0 sm:$0xff] }
   0xc   : > { %s397_s24 = sshll.u32 %s499_s23, 3  ;;  %v404_v1 = vld [vmem:[%s495_s4] ss:$0 sm:$0xff] }
   0xd   : > { %s263_s7 = scalar_lea.vmem %s491_s0, %s397_s24  ;;  %s269_s10 = scalar_lea.vmem %s492_s1, %s397_s24  ;;  %v403_v2 = vld [vmem:[%s494_s3] ss:$0 sm:$0xff] }
   0xe   : > { %v405_v3 = vld [vmem:[%s496_s5] ss:$0 sm:$0xff]  ;;  %v278_v5 = vld [vmem:[%s263_s7 + $0x8] sm:$0xff]  ;;  %s275_s17 = scalar_lea.vmem %s497_s6, %s397_s24 }
   0xf   : > { %v277_v4 = vld [vmem:[%s263_s7] sm:$0xff]  ;;  %v287_v8 = vmul.f32 %v402_v0, %v278_v5  ;;  %v298_v9 = vld [vmem:[%s269_s10 + $0x8] sm:$0xff] }
  0x10   : > { %v297_v6 = vld [vmem:[%s269_s10] sm:$0xff]  ;;  %v286_v7 = vmul.f32 %v402_v0, %v277_v4  ;;  %v307_v11 = vmul.f32 %v404_v1, %v298_v9 }
  0x11   : > { %v306_v10 = vmul.f32 %v404_v1, %v297_v6  ;;  %v296_v13 = vadd.f32 %v403_v2, %v287_v8 }
  0x12   : > { %v295_v12 = vadd.f32 %v403_v2, %v286_v7  ;;  %v316_v15 = vadd.f32 %v405_v3, %v307_v11 }
  0x13   : > { %v315_v14 = vadd.f32 %v405_v3, %v306_v10 }
  0x14   : > { %v318_v17 = vadd.f32 %v316_v15, %v296_v13 }
  0x15   : > { %v317_v16 = vadd.f32 %v315_v14, %v295_v12 }
  0x16   : > { %v320_v19 = vmax.f32 %v318_v17, 0.0 }
  0x17   : > { %v319_v18 = vmax.f32 %v317_v16, 0.0 }
  0x18   : > { %322 = vst [vmem:[%s275_s17 + $0x8] sm:$0xff] %v320_v19 }
  0x19   : > { %321 = vst [vmem:[%s275_s17] sm:$0xff] %v319_v18 }
  0x1a PF: > { %s16_s21 = sadd.s32 1, %s422_s21  }
  0x1b   : > { %p13_p4 = scmp.ge.s32.totalorder %s16_s21, 4  }
  0x1d   :  { %15 = sbr.rel (!%p13_p4) target bundleno = 1 (0x1), region = 77 }

// kernel: bottleneck_forward.5
= control target key start
LH: loop header
LB: loop body
LE: loop exit
PB: predicated region body
PF: predicated region fallthrough
CT: control target
= control target key end

     0   :  { %s785_s18 = smov 0   ;;  %s977_s0 = inlined_call_operand.vmem [shape: f32[32,128], index: 0, kind: input, shape index: {}]   ;;  %s978_s1 = inlined_call_operand.vmem [shape: f32[1,128], index: 1, kind: input, shape index: {}]   ;;  %s979_s2 = inlined_call_operand.vmem [shape: f32[1,128], index: 2, kind: input, shape index: {}]   ;;  %s980_s3 = inlined_call_operand.vmem [shape: f32[384,128], index: 3, kind: input, shape index: {}]   ;;  %s981_s4 = inlined_call_operand.vmem [shape: f32[32,128], index: 4, kind: output, shape index: {0}]   ;;  %s982_s5 = inlined_call_operand.vmem [shape: f32[2,2,128], index: 5, kind: output, shape index: {1}]  }
   0x1 LB: > { %s791_s19 = sadd.s32 4294967295, %s753_s18   ;;  %p636_p0 = scmp.ge.s32.totalorder %s753_s18, 1  ;;  %s753_s18 = sphi %s785_s18, %s16_s18  }
   0x2   : > { %p191_p1 = scmp.lt.s32.totalorder %s753_s18, 3 }
   0x4   : > { %p192_p2 = pnand %p636_p0, %p191_p1 }
   0x5   : > { %s637_s26 = sshll.u32 (!%p192_p2), %s791_s19, 1  ;;  %p235_p4 = scmp.lt.s32.totalorder (!%p192_p2), %s791_s19, 1 }
   0x6   : > { %195 = sbr.rel (%p192_p2) target bundleno = 265 (0x109), region = 36  ;;  %p811_p3 = scmp.lt.s32.totalorder (!%p192_p2), %s637_s26, 3 }
   0xb   : > { %v357_v0 = vld [vmem:[%s980_s3 + $0xf8] sm:$0xff]  ;;  %v356_v2 = vld [vmem:[%s980_s3 + $0xf0] sm:$0xff]  ;;  %v355_v5 = vld [vmem:[%s980_s3 + $0xe8] sm:$0xff]  ;;  %s985_s26 = smov (!%p811_p3, %s637_s26), 3  ;;  %v261_v32 = vlaneseq  ;;  %s987_s19 = smov (!%p235_p4, %s791_s19), 1  ;;  %vm542_vm4 = vcmask 1040384  }
   0xc   : > { %v341_v1 = vld [vmem:[%s980_s3 + $0x78] sm:$0xff]  ;;  %648 = vmatprep.subr.mxu0 %v357_v0  ;;  %v340_v4 = vld [vmem:[%s980_s3 + $0x70] sm:$0xff]  ;;  %v339_v7 = vld [vmem:[%s980_s3 + $0x68] sm:$0xff]  ;;  %s638_s11 = sshll.u32 %s985_s26, 3  ;;  %s641_s26 = sshll.u32 %s987_s19, 1 }
   0xd   : > { %v373_v3 = vld [vmem:[%s980_s3 + $0x178] sm:$0xff]  ;;  %649 = vmatpush3.msra.mxu0 %v341_v1  ;;  %v372_v6 = vld [vmem:[%s980_s3 + $0x170] sm:$0xff]  ;;  %v371_v8 = vld [vmem:[%s980_s3 + $0x168] sm:$0xff]  ;;  %s227_s24 = scalar_lea.vmem %s977_s0, %s638_s11  ;;  %v262_v43 = vshrl.u32 %v261_v32, 7  ;;  %s233_s20 = scalar_lea.vmem %s981_s4, %s638_s11 }
   0xe   : > { %704 = vmatprep.subr.mxu1 %v373_v3  ;;  %650 = vmatprep.subr.mxu0 %v356_v2  ;;  %v354_v9 = vld [vmem:[%s980_s3 + $0xe0] sm:$0xff]  ;;  %v353_v12 = vld [vmem:[%s980_s3 + $0xd8] sm:$0xff]  ;;  %v352_v15 = vld [vmem:[%s980_s3 + $0xd0] sm:$0xff]  ;;  %s238_s22 = scalar_lea.vmem %s982_s5, %s641_s26 }
   0xf   : > { %705 = vmatpush3.msra.mxu1 %v373_v3  ;;  %651 = vmatpush3.msra.mxu0 %v340_v4  ;;  %v338_v10 = vld [vmem:[%s980_s3 + $0x60] sm:$0xff]  ;;  %v337_v13 = vld [vmem:[%s980_s3 + $0x58] sm:$0xff]  ;;  %v336_v16 = vld [vmem:[%s980_s3 + $0x50] sm:$0xff]  ;;  %v263_v52 = vadd.s32 8, %v262_v43  ;;  %v268_v56 = vand.u32 15, %v262_v43  ;;  %vm292_vm0 = vcmp.lt.s32.totalorder %v262_v43, 1 }
  0x10   : > { %706 = vmatprep.subr.mxu1 %v372_v6  ;;  %652 = vmatprep.subr.mxu0 %v355_v5  ;;  %v370_v11 = vld [vmem:[%s980_s3 + $0x160] sm:$0xff]  ;;  %v369_v14 = vld [vmem:[%s980_s3 + $0x158] sm:$0xff]  ;;  %v368_v17 = vld [vmem:[%s980_s3 + $0x150] sm:$0xff]  ;;  %vm305_vm1 = vcmp.lt.s32.totalorder %v262_v43, 7 }
  0x11   : > { %707 = vmatpush3.msra.mxu1 %v372_v6  ;;  %653 = vmatpush3.msra.mxu0 %v339_v7  ;;  %v351_v18 = vld [vmem:[%s980_s3 + $0xc8] sm:$0xff]  ;;  %v350_v21 = vld [vmem:[%s980_s3 + $0xc0] sm:$0xff]  ;;  %v349_v24 = vld [vmem:[%s980_s3 + $0xb8] sm:$0xff]  ;;  %v275_v0 = vand.u32 15, %v263_v52  ;;  %vm288_vm2 = vcmp.gt.s32.totalorder %v268_v56, 0 }
  0x12   : > { %708 = vmatprep.subr.mxu1 %v371_v8  ;;  %654 = vmatprep.subr.mxu0 %v354_v9  ;;  %v335_v19 = vld [vmem:[%s980_s3 + $0x48] sm:$0xff]  ;;  %v334_v22 = vld [vmem:[%s980_s3 + $0x40] sm:$0xff]  ;;  %v333_v25 = vld [vmem:[%s980_s3 + $0x38] sm:$0xff] }
  0x13   : > { %709 = vmatpush3.msra.mxu1 %v371_v8  ;;  %655 = vmatpush3.msra.mxu0 %v338_v10  ;;  %v367_v20 = vld [vmem:[%s980_s3 + $0x148] sm:$0xff]  ;;  %v366_v23 = vld [vmem:[%s980_s3 + $0x140] sm:$0xff]  ;;  %v348_v26 = vld [vmem:[%s980_s3 + $0xb0] sm:$0xff]  ;;  %vm302_vm3 = vcmp.lt.s32.totalorder %v275_v0, 15 }
  0x14   : > { %710 = vmatprep.subr.mxu1 %v370_v11  ;;  %656 = vmatprep.subr.mxu0 %v353_v12  ;;  %v365_v27 = vld [vmem:[%s980_s3 + $0x138] sm:$0xff]  ;;  %v239_v28 = vld [vmem:[%s227_s24] sm:$0xff]  ;;  %v240_v29 = vld [vmem:[%s227_s24 + $0x8] sm:$0xff] }
  0x15   : > { %711 = vmatpush3.msra.mxu1 %v370_v11  ;;  %657 = vmatpush3.msra.mxu0 %v337_v13  ;;  %v642_v30 = vld [vmem:[%s978_s1] ss:$0 sm:$0xff]  ;;  %v332_v33 = vld [vmem:[%s980_s3 + $0x30] sm:$0xff]  ;;  %v347_v37 = vld [vmem:[%s980_s3 + $0xa8] sm:$0xff] }
  0x16   : > { %712 = vmatprep.subr.mxu1 %v369_v14  ;;  %658 = vmatprep.subr.mxu0 %v352_v15  ;;  %v643_v31 = vld [vmem:[%s979_s2] ss:$0 sm:$0xff]  ;;  %v364_v34 = vld [vmem:[%s980_s3 + $0x130] sm:$0xff]  ;;  %v248_v35 = vmul.f32 %v642_v30, %v239_v28  ;;  %v249_v36 = vmul.f32 %v642_v30, %v240_v29  ;;  %v331_v38 = vld [vmem:[%s980_s3 + $0x28] sm:$0xff] }
  0x17   : > { %713 = vmatpush3.msra.mxu1 %v369_v14  ;;  %659 = vmatpush3.msra.mxu0 %v336_v16  ;;  %v363_v39 = vld [vmem:[%s980_s3 + $0x128] sm:$0xff]  ;;  %v346_v42 = vld [vmem:[%s980_s3 + $0xa0] sm:$0xff]  ;;  %v345_v46 = vld [vmem:[%s980_s3 + $0x98] sm:$0xff] }
  0x18   : > { %714 = vmatprep.subr.mxu1 %v368_v17  ;;  %660 = vmatprep.subr.mxu0 %v351_v18  ;;  %v257_v40 = vadd.f32 %v643_v31, %v248_v35  ;;  %v258_v41 = vadd.f32 %v643_v31, %v249_v36  ;;  %v330_v44 = vld [vmem:[%s980_s3 + $0x20] sm:$0xff]  ;;  %v329_v49 = vld [vmem:[%s980_s3 + $0x18] sm:$0xff]  ;;  %v344_v51 = vld [vmem:[%s980_s3 + $0x90] sm:$0xff] }
  0x19   : > { %715 = vmatpush3.msra.mxu1 %v368_v17  ;;  %661 = vmatpush3.msra.mxu0 %v335_v19  ;;  %v362_v45 = vld [vmem:[%s980_s3 + $0x120] sm:$0xff]  ;;  %v361_v50 = vld [vmem:[%s980_s3 + $0x118] sm:$0xff]  ;;  %v328_v53 = vld [vmem:[%s980_s3 + $0x10] sm:$0xff] }
  0x1a   : > { %716 = vmatprep.subr.mxu1 %v367_v20  ;;  %662 = vmatprep.subr.mxu0 %v350_v21  ;;  %v259_v47 = vmax.f32 %v257_v40, 0.0  ;;  %v260_v48 = vmax.f32 %v258_v41, 0.0  ;;  %v360_v54 = vld [vmem:[%s980_s3 + $0x110] sm:$0xff]  ;;  %v343_v55 = vld [vmem:[%s980_s3 + $0x88] sm:$0xff]  ;;  %v342_v63 = vld [vmem:[%s980_s3 + $0x80] sm:$0xff] }
  0x1b   : > { %717 = vmatpush3.msra.mxu1 %v367_v20  ;;  %663 = vmatpush3.msra.mxu0 %v334_v22  ;;  %v327_v59 = vld [vmem:[%s980_s3 + $0x8] sm:$0xff]  ;;  %v326_v1 = vld [vmem:[%s980_s3] sm:$0xff] }
  0x1c   : > { %718 = vmatprep.subr.mxu1 %v366_v23  ;;  %664 = vmatprep.subr.mxu0 %v349_v24  ;;  %v290_v57 = vrot.slane %v259_v47, 7  ;;  %v291_v58 = vrot.slane %v260_v48, 7  ;;  %v359_v60 = vld [vmem:[%s980_s3 + $0x108] sm:$0xff]  ;;  %v303_v61 = vrot.slane %v259_v47, 1  ;;  %v304_v62 = vrot.slane %v260_v48, 1  ;;  %v358_v3 = vld [vmem:[%s980_s3 + $0x100] sm:$0xff] }
  0x1d   : > { %719 = vmatpush3.msra.mxu1 %v366_v23  ;;  %665 = vmatpush3.msra.mxu0 %v333_v25 }
  0x1e   : > { %720 = vmatprep.subr.mxu1 %v365_v27  ;;  %666 = vmatprep.subr.mxu0 %v348_v26  ;;  %v294_v2 = vsel %vm292_vm0, %v291_v58, %v290_v57  ;;  %v306_v4 = vsel %vm305_vm1, %v303_v61, %v304_v62  ;;  %v307_v5 = vsel %vm305_vm1, %v304_v62, %v303_v61 }
  0x1f   : > { %721 = vmatpush3.msra.mxu1 %v365_v27  ;;  %667 = vmatpush3.msra.mxu0 %v332_v33  ;;  %v293_v6 = vsel %vm292_vm0, %v290_v57, %v291_v58 }
  0x20   : > { %722 = vmatprep.subr.mxu1 %v364_v34  ;;  %668 = vmatprep.subr.mxu0 %v347_v37 }
  0x21   : > { %723 = vmatpush3.msra.mxu1 %v364_v34  ;;  %669 = vmatpush3.msra.mxu0 %v331_v38 }
  0x22   : > { %724 = vmatprep.subr.mxu1 %v363_v39  ;;  %670 = vmatprep.subr.mxu0 %v346_v42 }
  0x23   : > { %725 = vmatpush3.msra.mxu1 %v363_v39  ;;  %671 = vmatpush3.msra.mxu0 %v330_v44 }
  0x24   : > { %726 = vmatprep.subr.mxu1 %v362_v45  ;;  %672 = vmatprep.subr.mxu0 %v345_v46 }
  0x25   : > { %727 = vmatpush3.msra.mxu1 %v362_v45  ;;  %673 = vmatpush3.msra.mxu0 %v329_v49 }
  0x26   : > { %728 = vmatprep.subr.mxu1 %v361_v50  ;;  %674 = vmatprep.subr.mxu0 %v344_v51 }
  0x27   : > { %729 = vmatpush3.msra.mxu1 %v361_v50  ;;  %675 = vmatpush3.msra.mxu0 %v328_v53 }
  0x28   : > { %730 = vmatprep.subr.mxu1 %v360_v54  ;;  %676 = vmatprep.subr.mxu0 %v343_v55 }
  0x29   : > { %731 = vmatpush3.msra.mxu1 %v360_v54  ;;  %677 = vmatpush3.msra.mxu0 %v327_v59 }
  0x2a   : > { %732 = vmatprep.subr.mxu1 %v359_v60  ;;  %678 = vmatprep.subr.mxu0 %v342_v63 }
  0x2b   : > { %438 = vmatprep.mubr.f32.mxu0 %v259_v47  ;;  %679 = vmatpush3.msra.mxu0 %v326_v1 }
  0x2c   : > { %733 = vmatpush3.msra.mxu1 %v359_v60  ;;  %646 = vmatmul.mubr.msk.f32.vlgmr.msra.gmra.mxu0 %vm288_vm2, %v294_v2 }
  0x2d   : > { %734 = vmatprep.subr.mxu1 %v358_v3  ;;  %736 = vmatprep.mubr.f32.mxu1 %v306_v4 }
  0x2e   : > { %735 = vmatpush3.msra.mxu1 %v358_v3  ;;  %443 = vmatprep.mubr.f32.mxu0 %v260_v48 }
  0x2f   : > { %737 = vmatmul.mubr.msk.f32.vlgmr.msra.gmra.mxu1 %vm302_vm3, %v307_v5 }
  0x30   : > { %444 = vmatmul.mubr.f32.gmra.mxu0 %v293_v6 }
  0xec   : > { %v680_v7 = vpop.f32.mrf.mxu0 }
  0xee   : > { %v681_v8 = vpop.f32.mrf.mxu0 }
  0xef   : > { %v738_v9 = vpop.f32.mrf.mxu1  ;;  %v682_v10 = vadd.f32 %v681_v8, %v680_v7 }
  0xf0   : > { %v683_v11 = vpop.f32.mrf.mxu0 }
  0xf1   : > { %v515_v12 = vpop.f32.mrf.mxu1 }
  0xf2   : > { %v516_v13 = vadd.f32 %v682_v10, %v515_v12  ;;  %v684_v14 = vpop.f32.mrf.mxu0 }
  0xf3   : > { %v685_v15 = vadd.f32 %v684_v14, %v683_v11 }
  0xf4   : > { %524 = vst [vmem:[%s233_s20] sm:$0xff] %v516_v13  ;;  %v533_v17 = vmul.f32 %v516_v13, %v516_v13 }
  0xf5   : > { %v521_v16 = vadd.f32 %v738_v9, %v685_v15 }
  0xf7   : > { %525 = vst [vmem:[%s233_s20 + $0x8] sm:$0xff] %v521_v16  ;;  %v526_v18 = vadd.f32 %v521_v16, %v516_v13  ;;  %v534_v19 = vmul.f32 %v521_v16, %v521_v16 }
  0xf9   : > { %v527_v20 = vrot.slane %v526_v18, 4  ;;  %v535_v21 = vadd.f32 %v534_v19, %v533_v17 }
  0xfb   : > { %v528_v22 = vadd.f32 %v527_v20, %v526_v18  ;;  %v536_v23 = vrot.slane %v535_v21, 4 }
  0xfd   : > { %v529_v24 = vrot.slane %v528_v22, 2  ;;  %v537_v25 = vadd.f32 %v536_v23, %v535_v21 }
  0xff   : > { %v530_v26 = vadd.f32 %v529_v24, %v528_v22  ;;  %v538_v27 = vrot.slane %v537_v25, 2 }
 0x101   : > { %v531_v28 = vrot.slane %v530_v26, 1  ;;  %v539_v29 = vadd.f32 %v538_v27, %v537_v25 }
 0x103   : > { %v540_v30 = vrot.slane %v539_v29, 1  ;;  %v532_v31 = vadd.f32 %v531_v28, %v530_v26 }
 0x105   : > { %v541_v32 = vadd.f32 %v540_v30, %v539_v29 }
 0x107   : > { %v543_v33 = vsel %vm542_vm4, %v532_v31, %v541_v32 }
 0x108   : > { %544 = vst [vmem:[%s238_s22] sm:$0x3] %v543_v33 }
 0x109 PF: > { %s16_s18 = sadd.s32 1, %s753_s18  }
 0x10a   : > { %p13_p5 = scmp.ge.s32.totalorder %s16_s18, 4  }
 0x10c   :  { %15 = sbr.rel (!%p13_p5) target bundleno = 1 (0x1), region = 78 }

// kernel: bottleneck_forward.6
= control target key start
LH: loop header
LB: loop body
LE: loop exit
PB: predicated region body
PF: predicated region fallthrough
CT: control target
= control target key end

     0   :  { %s994_s30 = smov 0   ;;  %s1136_s0 = inlined_call_operand.vmem [shape: f32[32,128], index: 0, kind: input, shape index: {}]   ;;  %s1137_s1 = inlined_call_operand.vmem [shape: f32[1,128], index: 1, kind: input, shape index: {}]   ;;  %s1138_s2 = inlined_call_operand.vmem [shape: f32[1,128], index: 2, kind: input, shape index: {}]   ;;  %s1139_s3 = inlined_call_operand.vmem [shape: f32[128,128], index: 3, kind: input, shape index: {}]   ;;  %s1140_s4 = inlined_call_operand.vmem [shape: f32[32,128], index: 4, kind: input, shape index: {}]   ;;  %s1141_s5 = inlined_call_operand.vmem [shape: f32[128,128], index: 5, kind: input, shape index: {}]   ;;  %s1142_s6 = inlined_call_operand.vmem [shape: f32[32,128], index: 6, kind: output, shape index: {0}]   ;;  %s1143_s7 = inlined_call_operand.vmem [shape: f32[32,128], index: 7, kind: output, shape index: {1}]   ;;  %s1144_s8 = inlined_call_operand.vmem [shape: f32[2,2,128], index: 8, kind: output, shape index: {2}]   ;;  %s1145_s9 = inlined_call_operand.vmem [shape: f32[2,2,128], index: 9, kind: output, shape index: {3}]  }
   0x1 LB: > { %s1000_s10 = sadd.s32 4294967295, %s942_s30   ;;  %p807_p0 = scmp.ge.s32.totalorder %s942_s30, 1  ;;  %s942_s30 = sphi %s994_s30, %s20_s30  }
   0x2   : > { %p306_p1 = scmp.lt.s32.totalorder %s942_s30, 3 }
   0x4   : > { %p307_p2 = pnand %p807_p0, %p306_p1 }
   0x5   : > { %s808_s17 = sshll.u32 (!%p307_p2), %s1000_s10, 1  ;;  %p384_p4 = scmp.lt.s32.totalorder (!%p307_p2), %s1000_s10, 1 }
   0x6   : > { %310 = sbr.rel (%p307_p2) target bundleno = 259 (0x103), region = 44  ;;  %p361_p3 = scmp.lt.s32.totalorder (!%p307_p2), %s808_s17, 3 }
   0xb   : > { %v429_v0 = vld [vmem:[%s1139_s3 + $0x78] sm:$0xff]  ;;  %v428_v2 = vld [vmem:[%s1139_s3 + $0x70] sm:$0xff]  ;;  %v427_v4 = vld [vmem:[%s1139_s3 + $0x68] sm:$0xff]  ;;  %s1147_s17 = smov (!%p361_p3, %s808_s17), 3  ;;  %s1149_s10 = smov (!%p384_p4, %s1000_s10), 1  ;;  %vm618_vm0 = vcmask 1040384  }
   0xc   : > { %v522_v1 = vld [vmem:[%s1141_s5 + $0x78] sm:$0xff]  ;;  %858 = vmatprep.subr.mxu0 %v429_v0  ;;  %v521_v3 = vld [vmem:[%s1141_s5 + $0x70] sm:$0xff]  ;;  %v520_v5 = vld [vmem:[%s1141_s5 + $0x68] sm:$0xff]  ;;  %s1047_s22 = sshll.u32 %s1147_s17, 3 }
   0xd   : > { %893 = vmatprep.subr.mxu1 %v522_v1  ;;  %859 = vmatpush3.msra.mxu0 %v429_v0  ;;  %v426_v6 = vld [vmem:[%s1139_s3 + $0x60] sm:$0xff]  ;;  %v425_v8 = vld [vmem:[%s1139_s3 + $0x58] sm:$0xff]  ;;  %v424_v10 = vld [vmem:[%s1139_s3 + $0x50] sm:$0xff]  ;;  %s364_s13 = scalar_lea.vmem %s1136_s0, %s1047_s22  ;;  %s370_s28 = scalar_lea.vmem %s1140_s4, %s1047_s22 }
   0xe   : > { %894 = vmatpush3.msra.mxu1 %v522_v1  ;;  %860 = vmatprep.subr.mxu0 %v428_v2  ;;  %v519_v7 = vld [vmem:[%s1141_s5 + $0x60] sm:$0xff]  ;;  %v518_v9 = vld [vmem:[%s1141_s5 + $0x58] sm:$0xff]  ;;  %v517_v11 = vld [vmem:[%s1141_s5 + $0x50] sm:$0xff]  ;;  %s376_s15 = scalar_lea.vmem %s1142_s6, %s1047_s22  ;;  %s382_s19 = scalar_lea.vmem %s1143_s7, %s1047_s22 }
   0xf   : > { %895 = vmatprep.subr.mxu1 %v521_v3  ;;  %861 = vmatpush3.msra.mxu0 %v428_v2  ;;  %v423_v12 = vld [vmem:[%s1139_s3 + $0x48] sm:$0xff]  ;;  %v422_v14 = vld [vmem:[%s1139_s3 + $0x40] sm:$0xff]  ;;  %v421_v16 = vld [vmem:[%s1139_s3 + $0x38] sm:$0xff]  ;;  %s816_s22 = sshll.u32 %s1149_s10, 1 }
  0x10   : > { %896 = vmatpush3.msra.mxu1 %v521_v3  ;;  %862 = vmatprep.subr.mxu0 %v427_v4  ;;  %v516_v13 = vld [vmem:[%s1141_s5 + $0x48] sm:$0xff]  ;;  %v515_v15 = vld [vmem:[%s1141_s5 + $0x40] sm:$0xff]  ;;  %v514_v17 = vld [vmem:[%s1141_s5 + $0x38] sm:$0xff]  ;;  %s387_s23 = scalar_lea.vmem %s1144_s8, %s816_s22  ;;  %s391_s26 = scalar_lea.vmem %s1145_s9, %s816_s22 }
  0x11   : > { %897 = vmatprep.subr.mxu1 %v520_v5  ;;  %863 = vmatpush3.msra.mxu0 %v427_v4  ;;  %v420_v18 = vld [vmem:[%s1139_s3 + $0x30] sm:$0xff]  ;;  %v392_v20 = vld [vmem:[%s364_s13] sm:$0xff]  ;;  %v419_v22 = vld [vmem:[%s1139_s3 + $0x28] sm:$0xff] }
  0x12   : > { %898 = vmatpush3.msra.mxu1 %v520_v5  ;;  %864 = vmatprep.subr.mxu0 %v426_v6  ;;  %v513_v19 = vld [vmem:[%s1141_s5 + $0x30] sm:$0xff]  ;;  %v818_v21 = vld [vmem:[%s1137_s1] ss:$0 sm:$0xff]  ;;  %v512_v23 = vld [vmem:[%s1141_s5 + $0x28] sm:$0xff] }
  0x13   : > { %899 = vmatprep.subr.mxu1 %v519_v7  ;;  %865 = vmatpush3.msra.mxu0 %v426_v6  ;;  %v393_v24 = vld [vmem:[%s364_s13 + $0x8] sm:$0xff]  ;;  %v418_v25 = vld [vmem:[%s1139_s3 + $0x20] sm:$0xff]  ;;  %v401_v27 = vmul.f32 %v818_v21, %v392_v20  ;;  %v417_v29 = vld [vmem:[%s1139_s3 + $0x18] sm:$0xff] }
  0x14   : > { %900 = vmatpush3.msra.mxu1 %v519_v7  ;;  %866 = vmatprep.subr.mxu0 %v425_v8  ;;  %v511_v26 = vld [vmem:[%s1141_s5 + $0x20] sm:$0xff]  ;;  %v510_v30 = vld [vmem:[%s1141_s5 + $0x18] sm:$0xff]  ;;  %v402_v31 = vmul.f32 %v818_v21, %v393_v24  ;;  %v416_v32 = vld [vmem:[%s1139_s3 + $0x10] sm:$0xff] }
  0x15   : > { %901 = vmatprep.subr.mxu1 %v518_v9  ;;  %867 = vmatpush3.msra.mxu0 %v425_v8  ;;  %v819_v28 = vld [vmem:[%s1138_s2] ss:$0 sm:$0xff]  ;;  %v509_v33 = vld [vmem:[%s1141_s5 + $0x10] sm:$0xff]  ;;  %v415_v35 = vld [vmem:[%s1139_s3 + $0x8] sm:$0xff] }
  0x16   : > { %902 = vmatpush3.msra.mxu1 %v518_v9  ;;  %868 = vmatprep.subr.mxu0 %v424_v10  ;;  %v410_v34 = vadd.f32 %v819_v28, %v401_v27  ;;  %v508_v36 = vld [vmem:[%s1141_s5 + $0x8] sm:$0xff]  ;;  %v411_v37 = vadd.f32 %v819_v28, %v402_v31  ;;  %v414_v38 = vld [vmem:[%s1139_s3] sm:$0xff] }
  0x17   : > { %903 = vmatprep.subr.mxu1 %v517_v11  ;;  %869 = vmatpush3.msra.mxu0 %v424_v10  ;;  %v507_v39 = vld [vmem:[%s1141_s5] sm:$0xff]  ;;  %v506_v43 = vld [vmem:[%s370_s28 + $0x8] sm:$0xff] }
  0x18   : > { %904 = vmatpush3.msra.mxu1 %v517_v11  ;;  %870 = vmatprep.subr.mxu0 %v423_v12  ;;  %v412_v40 = vmax.f32 %v410_v34, 0.0  ;;  %v413_v41 = vmax.f32 %v411_v37, 0.0  ;;  %v505_v42 = vld [vmem:[%s370_s28] sm:$0xff] }
  0x19   : > { %905 = vmatprep.subr.mxu1 %v516_v13  ;;  %871 = vmatpush3.msra.mxu0 %v423_v12 }
  0x1a   : > { %906 = vmatpush3.msra.mxu1 %v516_v13  ;;  %872 = vmatprep.subr.mxu0 %v422_v14 }
  0x1b   : > { %907 = vmatprep.subr.mxu1 %v515_v15  ;;  %873 = vmatpush3.msra.mxu0 %v422_v14 }
  0x1c   : > { %908 = vmatpush3.msra.mxu1 %v515_v15  ;;  %874 = vmatprep.subr.mxu0 %v421_v16 }
  0x1d   : > { %909 = vmatprep.subr.mxu1 %v514_v17  ;;  %875 = vmatpush3.msra.mxu0 %v421_v16 }
  0x1e   : > { %910 = vmatpush3.msra.mxu1 %v514_v17  ;;  %876 = vmatprep.subr.mxu0 %v420_v18 }
  0x1f   : > { %911 = vmatprep.subr.mxu1 %v513_v19  ;;  %877 = vmatpush3.msra.mxu0 %v420_v18 }
  0x20   : > { %912 = vmatpush3.msra.mxu1 %v513_v19  ;;  %878 = vmatprep.subr.mxu0 %v419_v22 }
  0x21   : > { %913 = vmatprep.subr.mxu1 %v512_v23  ;;  %879 = vmatpush3.msra.mxu0 %v419_v22 }
  0x22   : > { %914 = vmatpush3.msra.mxu1 %v512_v23  ;;  %880 = vmatprep.subr.mxu0 %v418_v25 }
  0x23   : > { %915 = vmatprep.subr.mxu1 %v511_v26  ;;  %881 = vmatpush3.msra.mxu0 %v418_v25 }
  0x24   : > { %916 = vmatpush3.msra.mxu1 %v511_v26  ;;  %882 = vmatprep.subr.mxu0 %v417_v29 }
  0x25   : > { %917 = vmatprep.subr.mxu1 %v510_v30  ;;  %883 = vmatpush3.msra.mxu0 %v417_v29 }
  0x26   : > { %918 = vmatpush3.msra.mxu1 %v510_v30  ;;  %884 = vmatprep.subr.mxu0 %v416_v32 }
  0x27   : > { %919 = vmatprep.subr.mxu1 %v509_v33  ;;  %885 = vmatpush3.msra.mxu0 %v416_v32 }
  0x28   : > { %920 = vmatpush3.msra.mxu1 %v509_v33  ;;  %886 = vmatprep.subr.mxu0 %v415_v35 }
  0x29   : > { %921 = vmatprep.subr.mxu1 %v508_v36  ;;  %887 = vmatpush3.msra.mxu0 %v415_v35 }
  0x2a   : > { %922 = vmatpush3.msra.mxu1 %v508_v36  ;;  %888 = vmatprep.subr.mxu0 %v414_v38 }
  0x2b   : > { %923 = vmatprep.subr.mxu1 %v507_v39  ;;  %889 = vmatpush3.msra.mxu0 %v414_v38 }
  0x2c   : > { %890 = vmatprep.mubr.f32.mxu0 %v412_v40  ;;  %924 = vmatpush3.msra.mxu1 %v507_v39 }
  0x2d   : > { %925 = vmatprep.mubr.f32.mxu1 %v505_v42  ;;  %891 = vmatmul.mubr.f32.vlgmr.msra.gmra.mxu0 %v413_v41 }
  0x2e   : > { %926 = vmatmul.mubr.f32.vlgmr.msra.gmra.mxu1 %v506_v43 }
  0xed   : > { %v892_v44 = vpop.f32.mrf.mxu0 }
  0xee   : > { %v927_v45 = vpop.f32.mrf.mxu1  ;;  %v610_v46 = vmul.f32 %v892_v44, %v892_v44  ;;  %599 = vst [vmem:[%s376_s15 + $0x8] sm:$0xff] %v892_v44 }
  0xef   : > { %v629_v47 = vmul.f32 %v927_v45, %v927_v45  ;;  %v496_v48 = vpop.f32.mrf.mxu0  ;;  %601 = vst [vmem:[%s382_s19 + $0x8] sm:$0xff] %v927_v45 }
  0xf0   : > { %v589_v49 = vpop.f32.mrf.mxu1  ;;  %598 = vst [vmem:[%s376_s15] sm:$0xff] %v496_v48  ;;  %v602_v50 = vadd.f32 %v892_v44, %v496_v48  ;;  %v609_v51 = vmul.f32 %v496_v48, %v496_v48 }
  0xf1   : > { %600 = vst [vmem:[%s382_s19] sm:$0xff] %v589_v49  ;;  %v621_v52 = vadd.f32 %v927_v45, %v589_v49  ;;  %v628_v53 = vmul.f32 %v589_v49, %v589_v49 }
  0xf2   : > { %v603_v54 = vrot.slane %v602_v50, 4  ;;  %v611_v55 = vadd.f32 %v610_v46, %v609_v51 }
  0xf3   : > { %v622_v56 = vrot.slane %v621_v52, 4  ;;  %v630_v57 = vadd.f32 %v629_v47, %v628_v53 }
  0xf4   : > { %v604_v58 = vadd.f32 %v603_v54, %v602_v50  ;;  %v612_v59 = vrot.slane %v611_v55, 4 }
  0xf5   : > { %v623_v60 = vadd.f32 %v622_v56, %v621_v52  ;;  %v631_v61 = vrot.slane %v630_v57, 4 }
  0xf6   : > { %v605_v62 = vrot.slane %v604_v58, 2  ;;  %v613_v63 = vadd.f32 %v612_v59, %v611_v55 }
  0xf7   : > { %v624_v0 = vrot.slane %v623_v60, 2  ;;  %v632_v1 = vadd.f32 %v631_v61, %v630_v57 }
  0xf8   : > { %v606_v2 = vadd.f32 %v605_v62, %v604_v58  ;;  %v614_v3 = vrot.slane %v613_v63, 2 }
  0xf9   : > { %v625_v4 = vadd.f32 %v624_v0, %v623_v60  ;;  %v633_v5 = vrot.slane %v632_v1, 2 }
  0xfa   : > { %v607_v6 = vrot.slane %v606_v2, 1  ;;  %v615_v7 = vadd.f32 %v614_v3, %v613_v63 }
  0xfb   : > { %v626_v8 = vrot.slane %v625_v4, 1  ;;  %v634_v9 = vadd.f32 %v633_v5, %v632_v1 }
  0xfc   : > { %v616_v10 = vrot.slane %v615_v7, 1  ;;  %v608_v12 = vadd.f32 %v607_v6, %v606_v2 }
  0xfd   : > { %v635_v11 = vrot.slane %v634_v9, 1  ;;  %v627_v14 = vadd.f32 %v626_v8, %v625_v4 }
  0xfe   : > { %v617_v13 = vadd.f32 %v616_v10, %v615_v7 }
  0xff   : > { %v636_v15 = vadd.f32 %v635_v11, %v634_v9 }
 0x100   : > { %v619_v16 = vsel %vm618_vm0, %v608_v12, %v617_v13 }
 0x101   : > { %v637_v17 = vsel %vm618_vm0, %v627_v14, %v636_v15  ;;  %620 = vst [vmem:[%s387_s23] sm:$0x3] %v619_v16 }
 0x102   : > { %638 = vst [vmem:[%s391_s26] sm:$0x3] %v637_v17 }
 0x103 PF: > { %s20_s30 = sadd.s32 1, %s942_s30  }
 0x104   : > { %p17_p5 = scmp.ge.s32.totalorder %s20_s30, 4  }
 0x106   :  { %19 = sbr.rel (!%p17_p5) target bundleno = 1 (0x1), region = 113 }

</bundles_post_ra>
